<compile_context>
chip_gen: v6e
topology: v6e:2x2x1
jax: 0.10.0
libtpu: 0.0.40
codegen_flags: <defaults>
</compile_context>

<pallas_src>
import numpy as np

import jax
import jax.numpy as jnp
from jax.experimental import pallas as pl
from jax.experimental.pallas import tpu as pltpu

# ----------------------------- hyper-params ---------------------------------
B = 8                        # batch
D = 32                       # item / request embedding dim
NUM_ITEMS = 64               # item vocabulary
FIELD_VOCABS = (16, 16, 16)  # categorical feature fields of the recommender
F = len(FIELD_VOCABS) + 1    # + the item id field
HIDDEN_FM = 64               # DeepFM deep-tower hidden width
HIDDEN_CLS = 64              # classifier hidden width
NUM_CLASSES = 16             # classifier output width
TXT_VOCAB = 100              # encoder token vocabulary
SEQ = 8                      # tokens per request

FIELD_OFFS = tuple(int(x) for x in np.cumsum((0,) + FIELD_VOCABS)[:-1])  # (0,16,32)
ITEM_OFF = int(sum(FIELD_VOCABS))                                        # 48
V_ALL = ITEM_OFF + NUM_ITEMS                                             # 112  (rec vocab)
TOK_OFF = V_ALL                                                          # token ids start here
V_TOTAL = V_ALL + TXT_VOCAB                                              # 212  (combined vocab)
VOC_PAD = 256                # combined vocab padded to a clean lane tile
NSLOT = max(F, SEQ)          # id slots per packed row (8)
OUT_W = 64                   # packed output slab width
RHS_W = 2 * D + HIDDEN_FM    # 128 = [emb | emb^2 | fused deep]

_VMEM = pl.BlockSpec(memory_space=pltpu.MemorySpace.VMEM)


# ------------------------------- fused kernel --------------------------------
def _crecs_kernel(ids_ref, vals_ref, rhs_ref, aux_ref, clsw_ref, out_ref):
    f32 = jnp.float32
    ids = ids_ref[...]                                # (4B, NSLOT) int32, combined-vocab ids (-1 = pad)
    vals = vals_ref[...]                              # (4B, NSLOT) f32   (linear-term weights)
    rows = ids.shape[0]
    bsz = rows // 4

    # ---- build the fused one-hot / multi-hot / count LHS on the VPU ----
    # rows 0:B   = recommender multi-hot (fields + item)
    # rows B:2B  = anchor request token counts   (mean-pool == counts @ tok/SEQ)
    # rows 2B:3B = positive item one-hot
    # rows 3B:4B = negative item one-hot
    iota = jax.lax.broadcasted_iota(jnp.int32, (rows, VOC_PAD), 1)
    lhs = jnp.zeros((rows, VOC_PAD), f32)
    lhs_val = jnp.zeros((rows, VOC_PAD), f32)
    for t in range(NSLOT):                            # static unroll, 8 slots
        onehot = (iota == ids[:, t:t + 1]).astype(f32)
        lhs = lhs + onehot
        lhs_val = lhs_val + onehot * vals[:, t:t + 1]

    # ---- the one fused MXU matmul: (4B, 256) x (256, 128) ----
    # cols 0:D       = sum_f e_f            (FM "sum" / item & anchor embeddings)
    # cols D:2D      = sum_f e_f^2          (FM "square sum")
    # cols 2D:2D+H   = deep-tower pre-act   (block_table @ deep_w1 folded at init)
    big = jnp.dot(lhs, rhs_ref[...], preferred_element_type=f32)        # (4B, 128)

    # ---------------- DeepFM recommender head ----------------
    s = big[0:bsz, 0:D]
    sq = big[0:bsz, D:2 * D]
    fm = 0.5 * jnp.sum(s * s - sq, axis=1, keepdims=True)               # (B, 1)

    deep_b1 = aux_ref[1:2, 0:HIDDEN_FM]
    deep_w2 = aux_ref[2:3, 0:HIDDEN_FM]
    h = jnp.maximum(big[0:bsz, 2 * D:2 * D + HIDDEN_FM] + deep_b1, 0.0)  # (B, H)
    deep = jnp.sum(h * deep_w2, axis=1, keepdims=True)                   # (B, 1) VPU+XLU

    # first-order (linear) term on the VPU; row 0 of aux holds the lin weights
    lin = jnp.sum(lhs_val[0:bsz, :] * aux_ref[0:1, :], axis=1, keepdims=True)

    pred = jax.nn.sigmoid(lin + fm + deep + aux_ref[6:7, 0:1])           # (B, 1)

    # ---------------- [anchor; positive; negative] embeddings ----------------
    # Already contiguous in the matmul output; enc_b applies to anchor rows only.
    emb = big[bsz:4 * bsz, 0:D]                                          # (3B, D)
    row_i = jax.lax.broadcasted_iota(jnp.int32, (3 * bsz, 1), 0)
    emb = emb + jnp.where(row_i < bsz, 1.0, 0.0) * aux_ref[4:5, 0:D]

    # ---------------- batched classifier (one pass over 3B rows) -------------
    cls_w1 = clsw_ref[0:D, :]                                            # (D, HID_CLS)
    cls_w2 = clsw_ref[D:D + HIDDEN_CLS, 0:NUM_CLASSES]                   # (HID_CLS, C)
    hc = jnp.maximum(jnp.dot(emb, cls_w1, preferred_element_type=f32)
                     + aux_ref[3:4, 0:HIDDEN_CLS], 0.0)                  # (3B, HID_CLS)
    logits = (jnp.dot(hc, cls_w2, preferred_element_type=f32)
              + aux_ref[5:6, 0:NUM_CLASSES])                             # (3B, C)

    # ---------------- single lane-dense output slab ----------------
    # cols 0:D = embeddings, D:D+C = logits, col D+C (rows 0:B) = predictions.
    pred_col = jnp.concatenate([pred, jnp.zeros((2 * bsz, 1), f32)], axis=0)
    pad = jnp.zeros((3 * bsz, OUT_W - (D + NUM_CLASSES + 1)), f32)
    out_ref[...] = jnp.concatenate([emb, logits, pred_col, pad], axis=1)


# ---------------------------- parameter init ---------------------------------
def init_params(key):
    ks = iter(jax.random.split(key, 32))
    nrm = lambda shape, scale=0.1: scale * jax.random.normal(next(ks), shape, jnp.float32)

    # ---- logical (PyTorch-equivalent) parameters ----
    field_embs = [nrm((v, D)) for v in FIELD_VOCABS]
    item_emb = nrm((NUM_ITEMS, D))
    tables = field_embs + [item_emb]
    emb_table = jnp.concatenate(tables, axis=0)                          # (V_ALL, D)
    # block layout: rows of field f live in cols [f*D:(f+1)*D] (concat-free deep input)
    block_table = jnp.concatenate(
        [jnp.pad(t, ((0, 0), (f * D, (F - 1 - f) * D))) for f, t in enumerate(tables)],
        axis=0)                                                          # (V_ALL, F*D)
    lin_table = jnp.concatenate(
        [nrm((v, 1)) for v in FIELD_VOCABS] + [nrm((NUM_ITEMS, 1))], axis=0)[:, 0]

    deep_w1 = nrm((F * D, HIDDEN_FM))
    deep_b1 = jnp.zeros((HIDDEN_FM,), jnp.float32)
    deep_w2 = nrm((HIDDEN_FM,))
    head_bias = 0.0                                   # fm bias + deep final bias (folded)

    tok_emb = nrm((TXT_VOCAB, D))
    enc_w = nrm((D, D))
    enc_b = jnp.zeros((D,), jnp.float32)

    cls_w1 = nrm((D, HIDDEN_CLS))
    cls_b1 = jnp.zeros((HIDDEN_CLS,), jnp.float32)
    cls_w2 = nrm((HIDDEN_CLS, NUM_CLASSES))
    cls_b2 = jnp.zeros((NUM_CLASSES,), jnp.float32)

    # ---- constant folding + slab packing (done once, off the hot path) ----
    # fused matmul RHS: [emb | emb^2 | block_table @ deep_w1] over the rec vocab,
    # plus the fused token table ((tok_emb @ enc_w) / SEQ) over the token vocab.
    big_rhs = jnp.zeros((VOC_PAD, RHS_W), jnp.float32)                   # (256, 128)
    big_rhs = big_rhs.at[:V_ALL, 0:D].set(emb_table)
    big_rhs = big_rhs.at[:V_ALL, D:2 * D].set(emb_table * emb_table)
    big_rhs = big_rhs.at[:V_ALL, 2 * D:].set(block_table @ deep_w1)
    big_rhs = big_rhs.at[TOK_OFF:TOK_OFF + TXT_VOCAB, 0:D].set((tok_emb @ enc_w) / SEQ)

    # aux row-slab: lin weights + all biases + the N=1 deep projection + head bias
    aux = jnp.zeros((8, VOC_PAD), jnp.float32)
    aux = aux.at[0, :V_ALL].set(lin_table)
    aux = aux.at[1, :HIDDEN_FM].set(deep_b1)
    aux = aux.at[2, :HIDDEN_FM].set(deep_w2)
    aux = aux.at[3, :HIDDEN_CLS].set(cls_b1)
    aux = aux.at[4, :D].set(enc_b)
    aux = aux.at[5, :NUM_CLASSES].set(cls_b2)
    aux = aux.at[6, 0].set(head_bias)

    # classifier weight slab: [cls_w1 ; cls_w2 (zero-padded to HIDDEN_CLS cols)]
    cls_w = jnp.zeros((D + HIDDEN_CLS, HIDDEN_CLS), jnp.float32)         # (96, 64)
    cls_w = cls_w.at[:D, :].set(cls_w1)
    cls_w = cls_w.at[D:, :NUM_CLASSES].set(cls_w2)

    return {"big_rhs": big_rhs, "aux": aux, "cls_w": cls_w}


# ------------------------------ CRECS forward --------------------------------
def crecs_forward(params, rec_features, anchor_request_tokens, anchor_ids, negative_ids):
    # rec_features mirrors Tuple[List[Tensor], List[Tensor], Tensor]:
    #   (categorical field id lists, field value lists, item ids)
    # TODO(synk): string tokenization has no Pallas equivalent; requests arrive
    # pre-tokenized as anchor_request_tokens.
    field_ids, field_vals, item_ids_rec = rec_features
    bsz = item_ids_rec.shape[0]

    # ---- minimal marshaling: one packed id slab + one packed value slab ----
    # (offsets are compile-time constants, fused by XLA into the stacking ops)
    neg1 = lambda n: jnp.full((bsz, n), -1, jnp.int32)
    rec_ids = jnp.stack(
        [ids.astype(jnp.int32) + off for ids, off in zip(field_ids, FIELD_OFFS)]
        + [item_ids_rec.astype(jnp.int32) + ITEM_OFF], axis=1)            # (B, F)
    tok_row = anchor_request_tokens.astype(jnp.int32) + TOK_OFF           # (B, SEQ)
    if SEQ < NSLOT:
        tok_row = jnp.concatenate([tok_row, neg1(NSLOT - SEQ)], axis=1)
    ids_packed = jnp.concatenate([
        jnp.concatenate([rec_ids, neg1(NSLOT - F)], axis=1),
        tok_row,
        jnp.concatenate([(anchor_ids.astype(jnp.int32) + ITEM_OFF)[:, None], neg1(NSLOT - 1)], axis=1),
        jnp.concatenate([(negative_ids.astype(jnp.int32) + ITEM_OFF)[:, None], neg1(NSLOT - 1)], axis=1),
    ], axis=0)                                                            # (4B, NSLOT)

    vals_rec = jnp.stack([v.astype(jnp.float32) for v in field_vals]
                         + [jnp.ones((bsz,), jnp.float32)], axis=1)       # (B, F)
    vals_packed = jnp.concatenate(
        [jnp.concatenate([vals_rec, jnp.zeros((bsz, NSLOT - F), jnp.float32)], axis=1),
         jnp.zeros((3 * bsz, NSLOT), jnp.float32)], axis=0)               # (4B, NSLOT)

    out = pl.pallas_call(
        _crecs_kernel,
        out_shape=jax.ShapeDtypeStruct((3 * bsz, OUT_W), jnp.float32),
        in_specs=[_VMEM] * 5,
        out_specs=_VMEM,
    )(ids_packed, vals_packed, params["big_rhs"], params["aux"], params["cls_w"])

    # ---- split the packed output slab (views, no compute) ----
    rec_predictions = out[:bsz, D + NUM_CLASSES]                          # (B,)
    emb_slab = out[:, :D]
    logit_slab = out[:, D:D + NUM_CLASSES]
    anchor_embeddings = emb_slab[:bsz]
    positive_embeddings = emb_slab[bsz:2 * bsz]
    negative_embeddings = emb_slab[2 * bsz:]
    anchor_logits = logit_slab[:bsz]
    positive_logits = logit_slab[bsz:2 * bsz]
    negative_logits = logit_slab[2 * bsz:]

    anchor = (anchor_embeddings, anchor_logits, anchor_ids)
    positive = (positive_embeddings, positive_logits, anchor_ids)
    negative = (negative_embeddings, negative_logits, negative_ids)
    return rec_predictions, anchor, positive, negative


# ---------------------------------- main --------------------------------------
if __name__ == "__main__":
    key = jax.random.PRNGKey(0)
    pkey, dkey = jax.random.split(key)
    params = init_params(pkey)

    dks = iter(jax.random.split(dkey, 16))
    field_ids = [jax.random.randint(next(dks), (B,), 0, v, jnp.int32) for v in FIELD_VOCABS]
    field_vals = [jax.random.uniform(next(dks), (B,), jnp.float32) for _ in FIELD_VOCABS]
    item_ids_rec = jax.random.randint(next(dks), (B,), 0, NUM_ITEMS, jnp.int32)
    rec_features = (field_ids, field_vals, item_ids_rec)

    anchor_request_tokens = jax.random.randint(next(dks), (B, SEQ), 0, TXT_VOCAB, jnp.int32)
    anchor_ids = jax.random.randint(next(dks), (B,), 0, NUM_ITEMS, jnp.int32)
    negative_ids = jax.random.randint(next(dks), (B,), 0, NUM_ITEMS, jnp.int32)

    out = jax.jit(crecs_forward)(params, rec_features, anchor_request_tokens,
                                 anchor_ids, negative_ids)
    jax.block_until_ready(out)

    rec_predictions, anchor, positive, negative = out
    assert rec_predictions.shape == (B,)
    assert anchor[0].shape == (B, D) and anchor[1].shape == (B, NUM_CLASSES)
    assert positive[0].shape == (B, D) and positive[1].shape == (B, NUM_CLASSES)
    assert negative[0].shape == (B, D) and negative[1].shape == (B, NUM_CLASSES)
    assert bool(jnp.all((rec_predictions >= 0.0) & (rec_predictions <= 1.0)))
    assert bool(jnp.all(jnp.isfinite(anchor[1]))) and bool(jnp.all(jnp.isfinite(negative[1])))
    print("KERNEL_OK")
</pallas_src>

<mosaic_0001>
module attributes {stable_mosaic.version = 11 : i64} {
  func.func @_crecs_kernel(%arg0: memref<32x8xi32, #tpu.memory_space<vmem>>, %arg1: memref<32x8xf32, #tpu.memory_space<vmem>>, %arg2: memref<256x128xf32, #tpu.memory_space<vmem>>, %arg3: memref<8x256xf32, #tpu.memory_space<vmem>>, %arg4: memref<96x64xf32, #tpu.memory_space<vmem>>, %arg5: memref<24x64xf32, #tpu.memory_space<vmem>>) attributes {dimension_semantics = [], scalar_prefetch = 0 : i64, scratch_operands = 0 : i64, tpu.core_type = #tpu.core_type<tc>} {
    %c0 = arith.constant 0 : index
    %c0_0 = arith.constant 0 : index
    %0 = vector.load %arg0[%c0, %c0_0] : memref<32x8xi32, #tpu.memory_space<vmem>>, vector<32x8xi32>
    %c0_1 = arith.constant 0 : index
    %c0_2 = arith.constant 0 : index
    %1 = vector.load %arg1[%c0_1, %c0_2] : memref<32x8xf32, #tpu.memory_space<vmem>>, vector<32x8xf32>
    %2 = tpu.iota {dimensions = array<i32: 1>} : vector<32x256xi32>
    %cst = arith.constant 0.000000e+00 : f32
    %3 = vector.broadcast %cst : f32 to vector<32x256xf32>
    %cst_3 = arith.constant 0.000000e+00 : f32
    %4 = vector.broadcast %cst_3 : f32 to vector<32x256xf32>
    %5 = vector.extract_strided_slice %0 {offsets = [0, 0], sizes = [32, 1], strides = [1, 1]} : vector<32x8xi32> to vector<32x1xi32>
    %6 = vector.broadcast %5 : vector<32x1xi32> to vector<32x256xi32>
    %7 = arith.cmpi eq, %2, %6 : vector<32x256xi32>
    %8 = arith.extui %7 : vector<32x256xi1> to vector<32x256xi32>
    %9 = arith.sitofp %8 : vector<32x256xi32> to vector<32x256xf32>
    %10 = arith.addf %3, %9 : vector<32x256xf32>
    %11 = vector.extract_strided_slice %1 {offsets = [0, 0], sizes = [32, 1], strides = [1, 1]} : vector<32x8xf32> to vector<32x1xf32>
    %12 = vector.broadcast %11 : vector<32x1xf32> to vector<32x256xf32>
    %13 = arith.mulf %9, %12 : vector<32x256xf32>
    %14 = arith.addf %4, %13 : vector<32x256xf32>
    %15 = vector.extract_strided_slice %0 {offsets = [0, 1], sizes = [32, 1], strides = [1, 1]} : vector<32x8xi32> to vector<32x1xi32>
    %16 = vector.broadcast %15 : vector<32x1xi32> to vector<32x256xi32>
    %17 = arith.cmpi eq, %2, %16 : vector<32x256xi32>
    %18 = arith.extui %17 : vector<32x256xi1> to vector<32x256xi32>
    %19 = arith.sitofp %18 : vector<32x256xi32> to vector<32x256xf32>
    %20 = arith.addf %10, %19 : vector<32x256xf32>
    %21 = vector.extract_strided_slice %1 {offsets = [0, 1], sizes = [32, 1], strides = [1, 1]} : vector<32x8xf32> to vector<32x1xf32>
    %22 = vector.broadcast %21 : vector<32x1xf32> to vector<32x256xf32>
    %23 = arith.mulf %19, %22 : vector<32x256xf32>
    %24 = arith.addf %14, %23 : vector<32x256xf32>
    %25 = vector.extract_strided_slice %0 {offsets = [0, 2], sizes = [32, 1], strides = [1, 1]} : vector<32x8xi32> to vector<32x1xi32>
    %26 = vector.broadcast %25 : vector<32x1xi32> to vector<32x256xi32>
    %27 = arith.cmpi eq, %2, %26 : vector<32x256xi32>
    %28 = arith.extui %27 : vector<32x256xi1> to vector<32x256xi32>
    %29 = arith.sitofp %28 : vector<32x256xi32> to vector<32x256xf32>
    %30 = arith.addf %20, %29 : vector<32x256xf32>
    %31 = vector.extract_strided_slice %1 {offsets = [0, 2], sizes = [32, 1], strides = [1, 1]} : vector<32x8xf32> to vector<32x1xf32>
    %32 = vector.broadcast %31 : vector<32x1xf32> to vector<32x256xf32>
    %33 = arith.mulf %29, %32 : vector<32x256xf32>
    %34 = arith.addf %24, %33 : vector<32x256xf32>
    %35 = vector.extract_strided_slice %0 {offsets = [0, 3], sizes = [32, 1], strides = [1, 1]} : vector<32x8xi32> to vector<32x1xi32>
    %36 = vector.broadcast %35 : vector<32x1xi32> to vector<32x256xi32>
    %37 = arith.cmpi eq, %2, %36 : vector<32x256xi32>
    %38 = arith.extui %37 : vector<32x256xi1> to vector<32x256xi32>
    %39 = arith.sitofp %38 : vector<32x256xi32> to vector<32x256xf32>
    %40 = arith.addf %30, %39 : vector<32x256xf32>
    %41 = vector.extract_strided_slice %1 {offsets = [0, 3], sizes = [32, 1], strides = [1, 1]} : vector<32x8xf32> to vector<32x1xf32>
    %42 = vector.broadcast %41 : vector<32x1xf32> to vector<32x256xf32>
    %43 = arith.mulf %39, %42 : vector<32x256xf32>
    %44 = arith.addf %34, %43 : vector<32x256xf32>
    %45 = vector.extract_strided_slice %0 {offsets = [0, 4], sizes = [32, 1], strides = [1, 1]} : vector<32x8xi32> to vector<32x1xi32>
    %46 = vector.broadcast %45 : vector<32x1xi32> to vector<32x256xi32>
    %47 = arith.cmpi eq, %2, %46 : vector<32x256xi32>
    %48 = arith.extui %47 : vector<32x256xi1> to vector<32x256xi32>
    %49 = arith.sitofp %48 : vector<32x256xi32> to vector<32x256xf32>
    %50 = arith.addf %40, %49 : vector<32x256xf32>
    %51 = vector.extract_strided_slice %1 {offsets = [0, 4], sizes = [32, 1], strides = [1, 1]} : vector<32x8xf32> to vector<32x1xf32>
    %52 = vector.broadcast %51 : vector<32x1xf32> to vector<32x256xf32>
    %53 = arith.mulf %49, %52 : vector<32x256xf32>
    %54 = arith.addf %44, %53 : vector<32x256xf32>
    %55 = vector.extract_strided_slice %0 {offsets = [0, 5], sizes = [32, 1], strides = [1, 1]} : vector<32x8xi32> to vector<32x1xi32>
    %56 = vector.broadcast %55 : vector<32x1xi32> to vector<32x256xi32>
    %57 = arith.cmpi eq, %2, %56 : vector<32x256xi32>
    %58 = arith.extui %57 : vector<32x256xi1> to vector<32x256xi32>
    %59 = arith.sitofp %58 : vector<32x256xi32> to vector<32x256xf32>
    %60 = arith.addf %50, %59 : vector<32x256xf32>
    %61 = vector.extract_strided_slice %1 {offsets = [0, 5], sizes = [32, 1], strides = [1, 1]} : vector<32x8xf32> to vector<32x1xf32>
    %62 = vector.broadcast %61 : vector<32x1xf32> to vector<32x256xf32>
    %63 = arith.mulf %59, %62 : vector<32x256xf32>
    %64 = arith.addf %54, %63 : vector<32x256xf32>
    %65 = vector.extract_strided_slice %0 {offsets = [0, 6], sizes = [32, 1], strides = [1, 1]} : vector<32x8xi32> to vector<32x1xi32>
    %66 = vector.broadcast %65 : vector<32x1xi32> to vector<32x256xi32>
    %67 = arith.cmpi eq, %2, %66 : vector<32x256xi32>
    %68 = arith.extui %67 : vector<32x256xi1> to vector<32x256xi32>
    %69 = arith.sitofp %68 : vector<32x256xi32> to vector<32x256xf32>
    %70 = arith.addf %60, %69 : vector<32x256xf32>
    %71 = vector.extract_strided_slice %1 {offsets = [0, 6], sizes = [32, 1], strides = [1, 1]} : vector<32x8xf32> to vector<32x1xf32>
    %72 = vector.broadcast %71 : vector<32x1xf32> to vector<32x256xf32>
    %73 = arith.mulf %69, %72 : vector<32x256xf32>
    %74 = arith.addf %64, %73 : vector<32x256xf32>
    %75 = vector.extract_strided_slice %0 {offsets = [0, 7], sizes = [32, 1], strides = [1, 1]} : vector<32x8xi32> to vector<32x1xi32>
    %76 = vector.broadcast %75 : vector<32x1xi32> to vector<32x256xi32>
    %77 = arith.cmpi eq, %2, %76 : vector<32x256xi32>
    %78 = arith.extui %77 : vector<32x256xi1> to vector<32x256xi32>
    %79 = arith.sitofp %78 : vector<32x256xi32> to vector<32x256xf32>
    %80 = arith.addf %70, %79 : vector<32x256xf32>
    %81 = vector.extract_strided_slice %1 {offsets = [0, 7], sizes = [32, 1], strides = [1, 1]} : vector<32x8xf32> to vector<32x1xf32>
    %82 = vector.broadcast %81 : vector<32x1xf32> to vector<32x256xf32>
    %83 = arith.mulf %79, %82 : vector<32x256xf32>
    %84 = arith.addf %74, %83 : vector<32x256xf32>
    %c0_4 = arith.constant 0 : index
    %c0_5 = arith.constant 0 : index
    %85 = vector.load %arg2[%c0_4, %c0_5] : memref<256x128xf32, #tpu.memory_space<vmem>>, vector<256x128xf32>
    %cst_6 = arith.constant dense<0.000000e+00> : vector<32x128xf32>
    %86 = tpu.matmul %80, %85, %cst_6 {dimension_numbers = #tpu.dot_dimension_numbers<[1], [0], [0], [1], [0, 0, 1, 1], [], []>} : vector<32x256xf32>, vector<256x128xf32>, vector<32x128xf32> -> vector<32x128xf32>
    %87 = vector.extract_strided_slice %86 {offsets = [0, 0], sizes = [8, 32], strides = [1, 1]} : vector<32x128xf32> to vector<8x32xf32>
    %88 = vector.extract_strided_slice %86 {offsets = [0, 32], sizes = [8, 32], strides = [1, 1]} : vector<32x128xf32> to vector<8x32xf32>
    %89 = arith.mulf %87, %87 : vector<8x32xf32>
    %90 = arith.subf %89, %88 : vector<8x32xf32>
    %cst_7 = arith.constant dense<0.000000e+00> : vector<8xf32>
    %91 = vector.multi_reduction <add>, %90, %cst_7 [1] : vector<8x32xf32> to vector<8xf32>
    %92 = vector.shape_cast %91 : vector<8xf32> to vector<8x1xf32>
    %cst_8 = arith.constant 5.000000e-01 : f32
    %93 = vector.broadcast %cst_8 : f32 to vector<8x1xf32>
    %94 = arith.mulf %93, %92 : vector<8x1xf32>
    %c1 = arith.constant 1 : index
    %c0_9 = arith.constant 0 : index
    %95 = vector.load %arg3[%c1, %c0_9] : memref<8x256xf32, #tpu.memory_space<vmem>>, vector<1x64xf32>
    %c2 = arith.constant 2 : index
    %c0_10 = arith.constant 0 : index
    %96 = vector.load %arg3[%c2, %c0_10] : memref<8x256xf32, #tpu.memory_space<vmem>>, vector<1x64xf32>
    %97 = vector.extract_strided_slice %86 {offsets = [0, 64], sizes = [8, 64], strides = [1, 1]} : vector<32x128xf32> to vector<8x64xf32>
    %98 = vector.broadcast %95 : vector<1x64xf32> to vector<8x64xf32>
    %99 = arith.addf %97, %98 : vector<8x64xf32>
    %cst_11 = arith.constant 0.000000e+00 : f32
    %100 = vector.broadcast %cst_11 : f32 to vector<8x64xf32>
    %101 = arith.maximumf %99, %100 : vector<8x64xf32>
    %102 = vector.broadcast %96 : vector<1x64xf32> to vector<8x64xf32>
    %103 = arith.mulf %101, %102 : vector<8x64xf32>
    %cst_12 = arith.constant dense<0.000000e+00> : vector<8xf32>
    %104 = vector.multi_reduction <add>, %103, %cst_12 [1] : vector<8x64xf32> to vector<8xf32>
    %105 = vector.shape_cast %104 : vector<8xf32> to vector<8x1xf32>
    %106 = vector.extract_strided_slice %84 {offsets = [0, 0], sizes = [8, 256], strides = [1, 1]} : vector<32x256xf32> to vector<8x256xf32>
    %c0_13 = arith.constant 0 : index
    %c0_14 = arith.constant 0 : index
    %107 = vector.load %arg3[%c0_13, %c0_14] : memref<8x256xf32, #tpu.memory_space<vmem>>, vector<1x256xf32>
    %108 = vector.broadcast %107 : vector<1x256xf32> to vector<8x256xf32>
    %109 = arith.mulf %106, %108 : vector<8x256xf32>
    %cst_15 = arith.constant dense<0.000000e+00> : vector<8xf32>
    %110 = vector.multi_reduction <add>, %109, %cst_15 [1] : vector<8x256xf32> to vector<8xf32>
    %111 = vector.shape_cast %110 : vector<8xf32> to vector<8x1xf32>
    %112 = arith.addf %111, %94 : vector<8x1xf32>
    %113 = arith.addf %112, %105 : vector<8x1xf32>
    %c6 = arith.constant 6 : index
    %c0_16 = arith.constant 0 : index
    %114 = vector.load %arg3[%c6, %c0_16] : memref<8x256xf32, #tpu.memory_space<vmem>>, vector<1x1xf32>
    %115 = vector.broadcast %114 : vector<1x1xf32> to vector<8x1xf32>
    %116 = arith.addf %113, %115 : vector<8x1xf32>
    %117 = arith.negf %116 : vector<8x1xf32>
    %118 = math.exp %117 : vector<8x1xf32>
    %cst_17 = arith.constant 1.000000e+00 : f32
    %119 = vector.broadcast %cst_17 : f32 to vector<8x1xf32>
    %120 = arith.addf %119, %118 : vector<8x1xf32>
    %121 = arith.divf %119, %120 : vector<8x1xf32>
    %122 = vector.extract_strided_slice %86 {offsets = [8, 0], sizes = [24, 32], strides = [1, 1]} : vector<32x128xf32> to vector<24x32xf32>
    %123 = tpu.iota {dimensions = array<i32: 0>} : vector<24x1xi32>
    %c8_i32 = arith.constant 8 : i32
    %124 = vector.broadcast %c8_i32 : i32 to vector<24x1xi32>
    %125 = arith.cmpi slt, %123, %124 : vector<24x1xi32>
    %cst_18 = arith.constant 1.000000e+00 : f32
    %cst_19 = arith.constant 0.000000e+00 : f32
    %126 = vector.broadcast %cst_18 : f32 to vector<24x1xf32>
    %127 = vector.broadcast %cst_19 : f32 to vector<24x1xf32>
    %128 = arith.select %125, %126, %127 : vector<24x1xi1>, vector<24x1xf32>
    %c4 = arith.constant 4 : index
    %c0_20 = arith.constant 0 : index
    %129 = vector.load %arg3[%c4, %c0_20] : memref<8x256xf32, #tpu.memory_space<vmem>>, vector<1x32xf32>
    %130 = vector.broadcast %128 : vector<24x1xf32> to vector<24x32xf32>
    %131 = vector.broadcast %129 : vector<1x32xf32> to vector<24x32xf32>
    %132 = arith.mulf %130, %131 : vector<24x32xf32>
    %133 = arith.addf %122, %132 : vector<24x32xf32>
    %c0_21 = arith.constant 0 : index
    %c0_22 = arith.constant 0 : index
    %134 = vector.load %arg4[%c0_21, %c0_22] : memref<96x64xf32, #tpu.memory_space<vmem>>, vector<32x64xf32>
    %c32 = arith.constant 32 : index
    %c0_23 = arith.constant 0 : index
    %135 = vector.load %arg4[%c32, %c0_23] : memref<96x64xf32, #tpu.memory_space<vmem>>, vector<64x16xf32>
    %cst_24 = arith.constant dense<0.000000e+00> : vector<24x64xf32>
    %136 = tpu.matmul %133, %134, %cst_24 {dimension_numbers = #tpu.dot_dimension_numbers<[1], [0], [0], [1], [0, 0, 1, 1], [], []>} : vector<24x32xf32>, vector<32x64xf32>, vector<24x64xf32> -> vector<24x64xf32>
    %c3 = arith.constant 3 : index
    %c0_25 = arith.constant 0 : index
    %137 = vector.load %arg3[%c3, %c0_25] : memref<8x256xf32, #tpu.memory_space<vmem>>, vector<1x64xf32>
    %138 = vector.broadcast %137 : vector<1x64xf32> to vector<24x64xf32>
    %139 = arith.addf %136, %138 : vector<24x64xf32>
    %cst_26 = arith.constant 0.000000e+00 : f32
    %140 = vector.broadcast %cst_26 : f32 to vector<24x64xf32>
    %141 = arith.maximumf %139, %140 : vector<24x64xf32>
    %cst_27 = arith.constant dense<0.000000e+00> : vector<24x16xf32>
    %142 = tpu.matmul %141, %135, %cst_27 {dimension_numbers = #tpu.dot_dimension_numbers<[1], [0], [0], [1], [0, 0, 1, 1], [], []>} : vector<24x64xf32>, vector<64x16xf32>, vector<24x16xf32> -> vector<24x16xf32>
    %c5 = arith.constant 5 : index
    %c0_28 = arith.constant 0 : index
    %143 = vector.load %arg3[%c5, %c0_28] : memref<8x256xf32, #tpu.memory_space<vmem>>, vector<1x16xf32>
    %144 = vector.broadcast %143 : vector<1x16xf32> to vector<24x16xf32>
    %145 = arith.addf %142, %144 : vector<24x16xf32>
    %cst_29 = arith.constant 0.000000e+00 : f32
    %146 = vector.broadcast %cst_29 : f32 to vector<16x1xf32>
    %147 = tpu.concatenate %121, %146 in 0 : vector<8x1xf32>, vector<16x1xf32> -> vector<24x1xf32>
    %cst_30 = arith.constant 0.000000e+00 : f32
    %148 = vector.broadcast %cst_30 : f32 to vector<24x15xf32>
    %149 = tpu.concatenate %133, %145, %147, %148 in 1 : vector<24x32xf32>, vector<24x16xf32>, vector<24x1xf32>, vector<24x15xf32> -> vector<24x64xf32>
    %c0_31 = arith.constant 0 : index
    %c0_32 = arith.constant 0 : index
    %150 = vector.load %arg5[%c0_31, %c0_32] : memref<24x64xf32, #tpu.memory_space<vmem>>, vector<24x64xf32>
    tpu.vector_store %arg5[%c0_31, %c0_32], %149 {strides = array<i32>} : memref<24x64xf32, #tpu.memory_space<vmem>>, vector<24x64xf32>,
    return
  }
}

</mosaic_0001>

<bundles_post_ra>
// kernel: crecs_forward.1
= control target key start
LH: loop header
LB: loop body
LE: loop exit
PB: predicated region body
PF: predicated region fallthrough
CT: control target
= control target key end

     0   :  { %v1102_v0 = vmov 2   ;;  %v1103_v1 = vmov 1   ;;  %v1104_v3 = vmov 0.0   ;;  %v1105_v5 = vmov 0   ;;  %s1111_s22 = smov 64   ;;  %s1113_s28 = smov 96   ;;  %s1756_s0 = inlined_call_operand.vmem [shape: s32[32,8], index: 0, kind: input, shape index: {}]   ;;  %s1757_s2 = inlined_call_operand.vmem [shape: f32[256,128], index: 2, kind: input, shape index: {}]   ;;  %s1758_s3 = inlined_call_operand.vmem [shape: f32[8,256], index: 3, kind: input, shape index: {}]   ;;  %s1759_s1 = inlined_call_operand.vmem [shape: f32[32,8], index: 1, kind: input, shape index: {}]   ;;  %s1760_s4 = inlined_call_operand.vmem [shape: f32[96,64], index: 4, kind: input, shape index: {}]   ;;  %s1761_s5 = inlined_call_operand.vmem [shape: f32[24,64], index: 5, kind: output, shape index: {}]  }
   0x1   :  { %1062 = vset.pattern.permute.xlu1 %v1102_v0  ;;  %1060 = vset.pattern.permute.xlu0 %v1103_v1  ;;  %v1151_v2 = vld [vmem:[%s1756_s0] sm:$0xff]  ;;  %v1159_v4 = vld [vmem:[%s1756_s0 + $0x8] sm:$0xff]  ;;  %v1168_v6 = vld [vmem:[%s1756_s0 + $0x10] sm:$0xff]  ;;  %v1106_v7 = vmov 5   ;;  %v1107_v8 = vmov 6   ;;  %v1108_v9 = vmov 4   ;;  %v25_v58 = vlaneseq }
   0x2   :  { %134 = vperm.xlu1 %1062, %v1151_v2   ;;  %82 = vperm.xlu0 %1060, %v1151_v2   ;;  %v1184_v10 = vld [vmem:[%s1756_s0 + $0x18] sm:$0xff]  ;;  %v1109_v11 = vmov 3   ;;  %v475_v14 = vld [vmem:[%s1757_s2 + $0xf0] sm:$0xff]  ;;  %v474_v16 = vld [vmem:[%s1757_s2 + $0xe8] sm:$0xff]  ;;  %v1110_v30 = vmov 7   ;;  %s1114_s24 = smov 32  }
   0x3   :  { %1004 = vmatprep.subr.mxu1 %v1104_v3  ;;  %v476_v12 = vld [vmem:[%s1757_s2 + $0xf8] sm:$0xff]  ;;  %v459_v15 = vld [vmem:[%s1757_s2 + $0x70] sm:$0xff]  ;;  %v458_v17 = vld [vmem:[%s1757_s2 + $0x68] sm:$0xff]  ;;  %v1357_v61 = vand.u32 127, %v25_v58  ;;  %s1115_s25 = smov 48  }
   0x4   :  { %v460_v13 = vld [vmem:[%s1757_s2 + $0x78] sm:$0xff]  ;;  %942 = vmatprep.subr.mxu0 %v476_v12  ;;  %v473_v18 = vld [vmem:[%s1757_s2 + $0xe0] sm:$0xff]  ;;  %v471_v22 = vld [vmem:[%s1757_s2 + $0xd0] sm:$0xff] }
   0x5   :  { %943 = vmatpush3.msra.mxu0 %v460_v13  ;;  %v457_v19 = vld [vmem:[%s1757_s2 + $0x60] sm:$0xff]  ;;  %v472_v20 = vld [vmem:[%s1757_s2 + $0xd8] sm:$0xff]  ;;  %v455_v23 = vld [vmem:[%s1757_s2 + $0x50] sm:$0xff]  ;;  %v1362_v63 = vadd.s32 128, %v1357_v61 }
   0x6   :  { %1063 = vset.pattern.permute.xlu1 %v1105_v5  ;;  %1061 = vset.pattern.permute.xlu0 %v1105_v5  ;;  %v456_v21 = vld [vmem:[%s1757_s2 + $0x58] sm:$0xff]  ;;  %v470_v24 = vld [vmem:[%s1757_s2 + $0xc8] sm:$0xff]  ;;  %v469_v26 = vld [vmem:[%s1757_s2 + $0xc0] sm:$0xff] }
   0x7   :  { %32 = vperm.xlu1 %1063, %v1159_v4   ;;  %29 = vperm.xlu0 %1061, %v1151_v2   ;;  %v454_v25 = vld [vmem:[%s1757_s2 + $0x48] sm:$0xff]  ;;  %v453_v27 = vld [vmem:[%s1757_s2 + $0x40] sm:$0xff]  ;;  %v468_v28 = vld [vmem:[%s1757_s2 + $0xb8] sm:$0xff] }
   0x8   :  { %944 = vmatprep.subr.mxu0 %v475_v14  ;;  %v452_v29 = vld [vmem:[%s1757_s2 + $0x38] sm:$0xff]  ;;  %v467_v31 = vld [vmem:[%s1757_s2 + $0xb0] sm:$0xff]  ;;  %v573_v33 = vld [vmem:[%s1758_s3 + $0x1] ss:$0 sm:$0xff] }
   0x9   :  { %945 = vmatpush3.msra.mxu0 %v459_v15  ;;  %v451_v32 = vld [vmem:[%s1757_s2 + $0x30] sm:$0xff]  ;;  %v466_v34 = vld [vmem:[%s1757_s2 + $0xa8] sm:$0xff]  ;;  %v465_v36 = vld [vmem:[%s1757_s2 + $0xa0] sm:$0xff] }
   0xa   :  { %946 = vmatprep.subr.mxu0 %v474_v16  ;;  %v450_v35 = vld [vmem:[%s1757_s2 + $0x28] sm:$0xff]  ;;  %v449_v37 = vld [vmem:[%s1757_s2 + $0x20] sm:$0xff]  ;;  %v464_v39 = vld [vmem:[%s1757_s2 + $0x98] sm:$0xff] }
   0xb   :  { %1064 = vset.pattern.permute.xlu1 %v1103_v1  ;;  %35 = vperm.xlu0 %1061, %v1168_v6   ;;  %v24_v38 = vld [vmem:[%s1759_s1] sm:$0xff]  ;;  %v448_v40 = vld [vmem:[%s1757_s2 + $0x18] sm:$0xff]  ;;  %v463_v41 = vld [vmem:[%s1757_s2 + $0x90] sm:$0xff] }
   0xc   :  { %85 = vperm.xlu1 %1064, %v1159_v4   ;;  %947 = vmatpush3.msra.mxu0 %v458_v17  ;;  %v447_v42 = vld [vmem:[%s1757_s2 + $0x10] sm:$0xff]  ;;  %v462_v43 = vld [vmem:[%s1757_s2 + $0x88] sm:$0xff]  ;;  %v461_v45 = vld [vmem:[%s1757_s2 + $0x80] sm:$0xff] }
   0xd   :  { %948 = vmatprep.subr.mxu0 %v473_v18  ;;  %v446_v44 = vld [vmem:[%s1757_s2 + $0x8] sm:$0xff]  ;;  %v445_v46 = vld [vmem:[%s1757_s2] sm:$0xff] }
   0xe   :  { %949 = vmatpush3.msra.mxu0 %v457_v19  ;;  %v574_v47 = vld [vmem:[%s1758_s3 + $0x2] ss:$0 sm:$0xff] }
   0xf   :  { %1069 = vset.pattern.permute.xlu0 %v1106_v7  ;;  %950 = vmatprep.subr.mxu0 %v472_v20 }
  0x10   :  { %1065 = vset.pattern.permute.xlu1 %v1102_v0  ;;  %290 = vperm.xlu0 %1069, %v1151_v2  }
  0x11   :  { %137 = vperm.xlu1 %1065, %v1159_v4   ;;  %951 = vmatpush3.msra.mxu0 %v456_v21 }
  0x12   :  { %952 = vmatprep.subr.mxu0 %v471_v22 }
  0x13   :  { %953 = vmatpush3.msra.mxu0 %v455_v23 }
  0x14   :  { %1072 = vset.pattern.permute.xlu0 %v1107_v8  ;;  %954 = vmatprep.subr.mxu0 %v470_v24 }
  0x15   :  { %1066 = vset.pattern.permute.xlu1 %v1108_v9  ;;  %342 = vperm.xlu0 %1072, %v1151_v2  }
  0x16   :  { %238 = vperm.xlu1 %1066, %v1151_v2   ;;  %955 = vmatpush3.msra.mxu0 %v454_v25 }
  0x17   :  { %956 = vmatprep.subr.mxu0 %v469_v26 }
  0x18   :  { %957 = vmatpush3.msra.mxu0 %v453_v27 }
  0x19   :  { %1077 = vset.pattern.permute.xlu0 %v1102_v0  ;;  %958 = vmatprep.subr.mxu0 %v468_v28 }
  0x1a   :  { %1067 = vset.pattern.permute.xlu1 %v1103_v1  ;;  %143 = vperm.xlu0 %1077, %v1184_v10  }
  0x1b   :  { %88 = vperm.xlu1 %1067, %v1168_v6   ;;  %959 = vmatpush3.msra.mxu0 %v452_v29 }
  0x1c   :  { %960 = vmatprep.subr.mxu0 %v467_v31 }
  0x1d   :  { %961 = vmatpush3.msra.mxu0 %v451_v32 }
  0x1e   :  { %1078 = vset.pattern.permute.xlu0 %v1109_v11  ;;  %962 = vmatprep.subr.mxu0 %v466_v34 }
  0x1f   :  { %1068 = vset.pattern.permute.xlu1 %v1109_v11  ;;  %186 = vperm.xlu0 %1078, %v1151_v2  }
  0x20   :  { %189 = vperm.xlu1 %1068, %v1159_v4   ;;  %963 = vmatpush3.msra.mxu0 %v450_v35 }
  0x21   :  { %964 = vmatprep.subr.mxu0 %v465_v36 }
  0x22   :  { %965 = vmatpush3.msra.mxu0 %v449_v37 }
  0x23   :  { %192 = vperm.xlu0 %1078, %v1168_v6   ;;  %966 = vmatprep.subr.mxu0 %v464_v39 }
  0x24   :  { %1070 = vset.pattern.permute.xlu1 %v1102_v0  ;;  %967 = vmatpush3.msra.mxu0 %v448_v40 }
  0x25   :  { %140 = vperm.xlu1 %1070, %v1168_v6   ;;  %968 = vmatprep.subr.mxu0 %v463_v41 }
  0x26   :  { %969 = vmatpush3.msra.mxu0 %v447_v42 }
  0x27   :  { %195 = vperm.xlu0 %1078, %v1184_v10   ;;  %970 = vmatprep.subr.mxu0 %v462_v43 }
  0x28   :  { %971 = vmatpush3.msra.mxu0 %v446_v44 }
  0x29   :  { %1071 = vset.pattern.permute.xlu1 %v1108_v9  ;;  %972 = vmatprep.subr.mxu0 %v461_v45 }
  0x2a   :  { %241 = vperm.xlu1 %1071, %v1159_v4   ;;  %973 = vmatpush3.msra.mxu0 %v445_v46 }
  0x2b   :  { %1083 = vset.pattern.permute.xlu0 %v1108_v9 }
  0x2c   :  { %247 = vperm.xlu0 %1083, %v1184_v10  }
  0x2e   :  { %1073 = vset.pattern.permute.xlu1 %v1105_v5 }
  0x2f   :  { %38 = vperm.xlu1 %1073, %v1184_v10  }
  0x30   :  { %1086 = vset.pattern.permute.xlu0 %v1110_v30 }
  0x31   :  { %400 = vperm.xlu0 %1086, %v1168_v6  }
  0x33   :  { %1074 = vset.pattern.permute.xlu1 %v1103_v1 }
  0x34   :  { %91 = vperm.xlu1 %1074, %v1184_v10  }
  0x35   :  { %576 = vrot.lane.b32.xlu0 %v573_v33, %s1111_s22 }
  0x36   :  { %1089 = vset.pattern.permute.xlu0 %v1105_v5 }
  0x38   :  { %1075 = vset.pattern.permute.xlu1 %v1106_v7 }
  0x39   :  { %293 = vperm.xlu1 %1075, %v1159_v4   ;;  %74 = vperm.xlu0 %1089, %v24_v38  }
  0x3d   :  { %1076 = vset.pattern.permute.xlu1 %v1110_v30  ;;  %1092 = vset.pattern.permute.xlu0 %v1109_v11 }
  0x3e   :  { %394 = vperm.xlu1 %1076, %v1151_v2   ;;  %230 = vperm.xlu0 %1092, %v24_v38  }
  0x42   :  { %1079 = vset.pattern.permute.xlu1 %v1108_v9  ;;  %1095 = vset.pattern.permute.xlu0 %v1107_v8 }
  0x43   :  { %244 = vperm.xlu1 %1079, %v1168_v6   ;;  %386 = vperm.xlu0 %1095, %v24_v38  }
  0x47   :  { %1080 = vset.pattern.permute.xlu1 %v1107_v8  ;;  %1097 = vset.pattern.permute.xlu0 %v1110_v30 }
  0x48   :  { %345 = vperm.xlu1 %1080, %v1159_v4  }
  0x4c   :  { %1081 = vset.pattern.permute.xlu1 %v1106_v7 }
  0x4d   :  { %296 = vperm.xlu1 %1081, %v1168_v6  }
  0x51   :  { %1082 = vset.pattern.permute.xlu1 %v1110_v30 }
  0x52   :  { %397 = vperm.xlu1 %1082, %v1159_v4  }
  0x56   :  { %1084 = vset.pattern.permute.xlu1 %v1107_v8 }
  0x57   :  { %348 = vperm.xlu1 %1084, %v1168_v6  }
  0x5b   :  { %1085 = vset.pattern.permute.xlu1 %v1106_v7 }
  0x5c   :  { %299 = vperm.xlu1 %1085, %v1184_v10  }
  0x60   :  { %1087 = vset.pattern.permute.xlu1 %v1107_v8 }
  0x61   :  { %351 = vperm.xlu1 %1087, %v1184_v10  }
  0x65   :  { %1088 = vset.pattern.permute.xlu1 %v1110_v30 }
  0x66   :  { %403 = vperm.xlu1 %1088, %v1184_v10  }
  0x6a   :  { %582 = vrot.lane.b32.xlu1 %v574_v47, %s1111_s22 }
  0x6b   :  { %1090 = vset.pattern.permute.xlu1 %v1103_v1 }
  0x6e   :  { %126 = vperm.xlu1 %1090, %v24_v38  }
  0x72   :  { %1091 = vset.pattern.permute.xlu1 %v1102_v0 }
  0x73   :  { %178 = vperm.xlu1 %1091, %v24_v38  }
  0x77   :  { %1093 = vset.pattern.permute.xlu1 %v1108_v9 }
  0x78   :  { %282 = vperm.xlu1 %1093, %v24_v38  }
  0x7c   :  { %1094 = vset.pattern.permute.xlu1 %v1106_v7 }
  0x7d   :  { %334 = vperm.xlu1 %1094, %v24_v38   ;;  %v135_v48 = vpop.permute.xlu1 %134  ;;  %v83_v50 = vpop.permute.xlu0 %82 }
  0x7e   :  { %vm93_vm0 = vcmp.eq.s32.totalorder %v1357_v61, %v83_v50  ;;  %vm94_vm1 = vcmp.eq.s32.totalorder %v1362_v63, %v83_v50  ;;  %vm145_vm4 = vcmp.eq.s32.totalorder %v1357_v61, %v135_v48  ;;  %vm146_vm5 = vcmp.eq.s32.totalorder %v1362_v63, %v135_v48 }
  0x7f   :  { %v1371_v1 = vsel %vm93_vm0, 1.0, %v1104_v3  ;;  %v1374_v2 = vsel %vm94_vm1, 1.0, %v1104_v3  ;;  %v1395_v11 = vsel %vm145_vm4, 1.0, %v1104_v3  ;;  %v1398_v12 = vsel %vm146_vm5, 1.0, %v1104_v3 }
  0x81   :  { %1096 = vset.pattern.permute.xlu1 %v1110_v30 }
  0x82   :  { %438 = vperm.xlu1 %1096, %v24_v38   ;;  %v1344_v49 = vpop.permute.xlu1 %32  ;;  %v30_v52 = vpop.permute.xlu0 %29 }
  0x83   :  { %vm40_vm2 = vcmp.eq.s32.totalorder %v1357_v61, %v30_v52  ;;  %vm41_vm3 = vcmp.eq.s32.totalorder %v1362_v63, %v30_v52  ;;  %vm42_vm14 = vcmp.eq.s32.totalorder %v1357_v61, %v1344_v49  ;;  %vm43_vm15 = vcmp.eq.s32.totalorder %v1362_v63, %v1344_v49 }
  0x84   :  { %v1379_v6 = vsel %vm40_vm2, 1.0, %v1104_v3  ;;  %v1382_v7 = vsel %vm41_vm3, 1.0, %v1104_v3  ;;  %v873_v40 = vsel %vm42_vm14, 1.0, %v1104_v3  ;;  %v874_v41 = vsel %vm43_vm15, 1.0, %v1104_v3 }
  0x85   :  { %v117_v8 = vadd.f32 %v1371_v1, %v1379_v6  ;;  %v118_v9 = vadd.f32 %v1374_v2, %v1382_v7 }
  0x86   :  { %v1350_v54 = vpop.permute.xlu0 %35 }
  0x87   :  { %v1346_v51 = vpop.permute.xlu1 %85  ;;  %v169_v15 = vadd.f32 %v1395_v11, %v117_v8  ;;  %v170_v16 = vadd.f32 %v1398_v12, %v118_v9 }
  0x88   :  { %vm95_vm0 = vcmp.eq.s32.totalorder %v1357_v61, %v1346_v51  ;;  %vm96_vm1 = vcmp.eq.s32.totalorder %v1362_v63, %v1346_v51 }
  0x89   :  { %v881_v36 = vsel %vm95_vm0, 1.0, %v1104_v3  ;;  %v882_v37 = vsel %vm96_vm1, 1.0, %v1104_v3 }
  0x8a   :  { %v119_v46 = vadd.f32 %v881_v36, %v873_v40  ;;  %v120_v47 = vadd.f32 %v882_v37, %v874_v41 }
  0x8b   :  { %v291_v56 = vpop.permute.xlu0 %290 }
  0x8c   :  { %v1348_v53 = vpop.permute.xlu1 %137  ;;  %vm301_vm10 = vcmp.eq.s32.totalorder %v1357_v61, %v291_v56  ;;  %vm302_vm11 = vcmp.eq.s32.totalorder %v1362_v63, %v291_v56 }
  0x8d   :  { %v1425_v24 = vsel %vm301_vm10, 1.0, %v1104_v3  ;;  %v1428_v25 = vsel %vm302_vm11, 1.0, %v1104_v3  ;;  %vm147_vm4 = vcmp.eq.s32.totalorder %v1357_v61, %v1348_v53  ;;  %vm148_vm5 = vcmp.eq.s32.totalorder %v1362_v63, %v1348_v53 }
  0x8e   :  { %v889_v42 = vsel %vm147_vm4, 1.0, %v1104_v3  ;;  %v890_v43 = vsel %vm148_vm5, 1.0, %v1104_v3 }
  0x8f   :  { %v171_v52 = vadd.f32 %v889_v42, %v119_v46  ;;  %v172_v53 = vadd.f32 %v890_v43, %v120_v47 }
  0x90   :  { %v343_v59 = vpop.permute.xlu0 %342 }
  0x91   :  { %v239_v55 = vpop.permute.xlu1 %238  ;;  %vm353_vm12 = vcmp.eq.s32.totalorder %v1357_v61, %v343_v59  ;;  %vm354_vm13 = vcmp.eq.s32.totalorder %v1362_v63, %v343_v59 }
  0x92   :  { %vm249_vm8 = vcmp.eq.s32.totalorder %v1357_v61, %v239_v55  ;;  %vm250_vm9 = vcmp.eq.s32.totalorder %v1362_v63, %v239_v55  ;;  %v1437_v29 = vsel %vm353_vm12, 1.0, %v1104_v3  ;;  %v1440_v30 = vsel %vm354_vm13, 1.0, %v1104_v3 }
  0x93   :  { %v1417_v20 = vsel %vm249_vm8, 1.0, %v1104_v3  ;;  %v1420_v21 = vsel %vm250_vm9, 1.0, %v1104_v3 }
  0x95   :  { %v1359_v62 = vpop.permute.xlu0 %143 }
  0x96   :  { %v1352_v57 = vpop.permute.xlu1 %88  ;;  %vm151_vm14 = vcmp.eq.s32.totalorder %v1357_v61, %v1359_v62  ;;  %vm152_vm15 = vcmp.eq.s32.totalorder %v1362_v63, %v1359_v62 }
  0x97   :  { %vm97_vm8 = vcmp.eq.s32.totalorder %v1357_v61, %v1352_v57  ;;  %vm98_vm9 = vcmp.eq.s32.totalorder %v1362_v63, %v1352_v57  ;;  %v1532_v8 = vsel %vm152_vm15, 1.0, %v1104_v3 }
  0x98   :  { %v883_v50 = vsel %vm97_vm8, 1.0, %v1104_v3  ;;  %v884_v51 = vsel %vm98_vm9, 1.0, %v1104_v3 }
  0x9a   :  { %v187_v4 = vpop.permute.xlu0 %186 }
  0x9b   :  { %v1354_v60 = vpop.permute.xlu1 %189  ;;  %vm197_vm6 = vcmp.eq.s32.totalorder %v1357_v61, %v187_v4  ;;  %vm198_vm7 = vcmp.eq.s32.totalorder %v1362_v63, %v187_v4  ;;  %v1529_v4 = vsel %vm151_vm14, 1.0, %v1104_v3 }
  0x9c   :  { %v1401_v13 = vsel %vm197_vm6, 1.0, %v1104_v3  ;;  %v1404_v14 = vsel %vm198_vm7, 1.0, %v1104_v3  ;;  %vm44_vm6 = vcmp.eq.s32.totalorder %v1357_v61, %v1350_v54  ;;  %vm45_vm7 = vcmp.eq.s32.totalorder %v1362_v63, %v1350_v54 }
  0x9d   :  { %v221_v17 = vadd.f32 %v1401_v13, %v169_v15  ;;  %v222_v18 = vadd.f32 %v1404_v14, %v170_v16  ;;  %v875_v48 = vsel %vm44_vm6, 1.0, %v1104_v3  ;;  %v876_v49 = vsel %vm45_vm7, 1.0, %v1104_v3 }
  0x9e   :  { %v193_v44 = vpop.permute.xlu0 %192  ;;  %vm199_vm12 = vcmp.eq.s32.totalorder %v1357_v61, %v1354_v60  ;;  %vm200_vm13 = vcmp.eq.s32.totalorder %v1362_v63, %v1354_v60  ;;  %v121_v56 = vadd.f32 %v883_v50, %v875_v48  ;;  %v122_v57 = vadd.f32 %v884_v51, %v876_v49 }
  0x9f   :  { %v273_v22 = vadd.f32 %v1417_v20, %v221_v17  ;;  %v274_v23 = vadd.f32 %v1420_v21, %v222_v18  ;;  %vm201_vm0 = vcmp.eq.s32.totalorder %v1357_v61, %v193_v44  ;;  %vm202_vm1 = vcmp.eq.s32.totalorder %v1362_v63, %v193_v44 }
  0xa0   :  { %v1364_v0 = vpop.permute.xlu1 %140  ;;  %v898_v60 = vsel %vm200_vm13, 1.0, %v1104_v3  ;;  %v899_v16 = vsel %vm201_vm0, 1.0, %v1104_v3  ;;  %v900_v17 = vsel %vm202_vm1, 1.0, %v1104_v3 }
  0xa1   :  { %v325_v27 = vadd.f32 %v1425_v24, %v273_v22  ;;  %v326_v28 = vadd.f32 %v1428_v25, %v274_v23  ;;  %vm149_vm10 = vcmp.eq.s32.totalorder %v1357_v61, %v1364_v0  ;;  %vm150_vm11 = vcmp.eq.s32.totalorder %v1362_v63, %v1364_v0 }
  0xa2   :  { %v891_v54 = vsel %vm149_vm10, 1.0, %v1104_v3  ;;  %v892_v55 = vsel %vm150_vm11, 1.0, %v1104_v3  ;;  %v897_v0 = vsel %vm199_vm12, 1.0, %v1104_v3  ;;  %v1526_v62 = vpop.permute.xlu0 %195  ;;  %v224_v18 = vadd.f32 %v898_v60, %v172_v53 }
  0xa3   :  { %v377_v32 = vadd.f32 %v1437_v29, %v325_v27  ;;  %v378_v33 = vadd.f32 %v1440_v30, %v326_v28  ;;  %v173_v9 = vadd.f32 %v891_v54, %v121_v56  ;;  %v174_v15 = vadd.f32 %v892_v55, %v122_v57 }
  0xa5   :  { %v1376_v5 = vpop.permute.xlu1 %241  ;;  %v225_v28 = vadd.f32 %v899_v16, %v173_v9 }
  0xa7   :  { %v1550_v37 = vpop.permute.xlu0 %247 }
  0xaa   :  { %v1392_v10 = vpop.permute.xlu1 %38 }
  0xab   :  { %vm46_vm6 = vcmp.eq.s32.totalorder %v1357_v61, %v1392_v10  ;;  %vm47_vm7 = vcmp.eq.s32.totalorder %v1362_v63, %v1392_v10 }
  0xac   :  { %v877_v10 = vsel %vm46_vm6, 1.0, %v1104_v3  ;;  %v401_v51 = vpop.permute.xlu0 %400 }
  0xaf   :  { %v1412_v19 = vpop.permute.xlu1 %91 }
  0xb0   :  { %vm99_vm12 = vcmp.eq.s32.totalorder %v1357_v61, %v1412_v19  ;;  %vm100_vm13 = vcmp.eq.s32.totalorder %v1362_v63, %v1412_v19 }
  0xb1   :  { %v885_v48 = vsel %vm99_vm12, 1.0, %v1104_v3  ;;  %v886_v19 = vsel %vm100_vm13, 1.0, %v1104_v3 }
  0xb4   :  { %v1432_v26 = vpop.permute.xlu1 %293 }
  0xb5   :  { %vm303_vm4 = vcmp.eq.s32.totalorder %v1357_v61, %v1432_v26  ;;  %vm304_vm5 = vcmp.eq.s32.totalorder %v1362_v63, %v1432_v26 }
  0xb6   :  { %v913_v26 = vsel %vm303_vm4, 1.0, %v1104_v3  ;;  %vm203_vm4 = vcmp.eq.s32.totalorder %v1357_v61, %v1526_v62 }
  0xb9   :  { %v395_v31 = vpop.permute.xlu1 %394 }
  0xba   :  { %vm405_vm2 = vcmp.eq.s32.totalorder %v1357_v61, %v395_v31  ;;  %vm406_vm3 = vcmp.eq.s32.totalorder %v1362_v63, %v395_v31  ;;  %v226_v31 = vadd.f32 %v900_v17, %v174_v15 }
  0xbb   :  { %v1459_v34 = vsel %vm405_vm2, 1.0, %v1104_v3  ;;  %v1462_v35 = vsel %vm406_vm3, 1.0, %v1104_v3  ;;  %vm251_vm2 = vcmp.eq.s32.totalorder %v1357_v61, %v1376_v5  ;;  %vm252_vm3 = vcmp.eq.s32.totalorder %v1362_v63, %v1376_v5 }
  0xbc   :  { %v429_v38 = vadd.f32 %v1459_v34, %v377_v32  ;;  %v430_v39 = vadd.f32 %v1462_v35, %v378_v33  ;;  %v223_v5 = vadd.f32 %v897_v0, %v171_v52  ;;  %v905_v22 = vsel %vm251_vm2, 1.0, %v1104_v3 }
  0xbd   :  { %v906_v23 = vsel %vm252_vm3, 1.0, %v1104_v3  ;;  %v914_v32 = vsel %vm304_vm5, 1.0, %v1104_v3  ;;  %vm409_vm2 = vcmp.eq.s32.totalorder %v1357_v61, %v401_v51  ;;  %vm410_vm3 = vcmp.eq.s32.totalorder %v1362_v63, %v401_v51 }
  0xbe   :  { %v1486_v45 = vpop.permute.xlu1 %244  ;;  %541 = vmatprep.mubr.f32.mxu0 %v430_v39  ;;  %v275_v33 = vadd.f32 %v905_v22, %v223_v5  ;;  %v276_v36 = vadd.f32 %v906_v23, %v224_v18  ;;  %vm204_vm5 = vcmp.eq.s32.totalorder %v1362_v63, %v1526_v62  ;;  %v931_v16 = vsel %vm409_vm2, 1.0, %v1104_v3 }
  0xbf   :  { %542 = vmatmul.mubr.f32.vlgmr.msra.gmra.mxu0 %v429_v38  ;;  %vm253_vm10 = vcmp.eq.s32.totalorder %v1357_v61, %v1486_v45  ;;  %vm254_vm11 = vcmp.eq.s32.totalorder %v1362_v63, %v1486_v45  ;;  %v878_v38 = vsel %vm47_vm7, 1.0, %v1104_v3  ;;  %v932_v17 = vsel %vm410_vm3, 1.0, %v1104_v3 }
  0xc0   :  { %v327_v41 = vadd.f32 %v913_v26, %v275_v33  ;;  %v328_v42 = vadd.f32 %v914_v32, %v276_v36  ;;  %v907_v43 = vsel %vm253_vm10, 1.0, %v1104_v3  ;;  %v908_v44 = vsel %vm254_vm11, 1.0, %v1104_v3 }
  0xc1   :  { %v277_v56 = vadd.f32 %v907_v43, %v225_v28  ;;  %v278_v57 = vadd.f32 %v908_v44, %v226_v31  ;;  %v124_v0 = vadd.f32 %v886_v19, %v878_v38  ;;  %v901_v31 = vsel %vm203_vm4, 1.0, %v1104_v3 }
  0xc2   :  { %v902_v26 = vsel %vm204_vm5, 1.0, %v1104_v3  ;;  %vm590_vm2 = vcmask 523264   ;;  %vm856_vm3 = vcmask 392192   ;;  %vm860_vm4 = vcmask 400384  }
  0xc3   :  { %v346_v59 = vpop.permute.xlu1 %345  ;;  %v176_v28 = vadd.f32 %v1532_v8, %v124_v0 }
  0xc4   :  { %vm355_vm8 = vcmp.eq.s32.totalorder %v1357_v61, %v346_v59  ;;  %vm356_vm9 = vcmp.eq.s32.totalorder %v1362_v63, %v346_v59  ;;  %v123_v59 = vadd.f32 %v885_v48, %v877_v10 }
  0xc5   :  { %v921_v39 = vsel %vm355_vm8, 1.0, %v1104_v3  ;;  %v922_v40 = vsel %vm356_vm9, 1.0, %v1104_v3  ;;  %vm255_vm8 = vcmp.eq.s32.totalorder %v1357_v61, %v1550_v37  ;;  %vm256_vm9 = vcmp.eq.s32.totalorder %v1362_v63, %v1550_v37 }
  0xc6   :  { %v379_v46 = vadd.f32 %v921_v39, %v327_v41  ;;  %v380_v47 = vadd.f32 %v922_v40, %v328_v42  ;;  %v228_v8 = vadd.f32 %v902_v26, %v176_v28  ;;  %v909_v62 = vsel %vm255_vm8, 1.0, %v1104_v3 }
  0xc7   :  { %v910_v10 = vsel %vm256_vm9, 1.0, %v1104_v3 }
  0xc8   :  { %v297_v27 = vpop.permute.xlu1 %296  ;;  %v280_v41 = vadd.f32 %v910_v10, %v228_v8 }
  0xc9   :  { %vm305_vm14 = vcmp.eq.s32.totalorder %v1357_v61, %v297_v27  ;;  %vm306_vm15 = vcmp.eq.s32.totalorder %v1362_v63, %v297_v27  ;;  %v175_v27 = vadd.f32 %v1529_v4, %v123_v59 }
  0xca   :  { %v915_v52 = vsel %vm305_vm14, 1.0, %v1104_v3  ;;  %v916_v53 = vsel %vm306_vm15, 1.0, %v1104_v3 }
  0xcb   :  { %v329_v9 = vadd.f32 %v915_v52, %v277_v56  ;;  %v330_v15 = vadd.f32 %v916_v53, %v278_v57  ;;  %v227_v4 = vadd.f32 %v901_v31, %v175_v27  ;;  %v597_v27 = vshrl.u32 %v25_v58, 7  ;;  %v594_v58 = vld [vmem:[%s1758_s3] ss:$8 sm:$0x3] }
  0xcd   :  { %v398_v45 = vpop.permute.xlu1 %397  ;;  %v279_v37 = vadd.f32 %v909_v62, %v227_v4 }
  0xce   :  { %vm407_vm0 = vcmp.eq.s32.totalorder %v1357_v61, %v398_v45  ;;  %vm408_vm1 = vcmp.eq.s32.totalorder %v1362_v63, %v398_v45 }
  0xcf   :  { %v929_v49 = vsel %vm407_vm0, 1.0, %v1104_v3  ;;  %v930_v50 = vsel %vm408_vm1, 1.0, %v1104_v3  ;;  %vm1112_vm0 = vmmov 0   ;;  %vm568_vm1 = vcmask 261120  }
  0xd0   :  { %v431_v54 = vadd.f32 %v929_v49, %v379_v46  ;;  %v432_v55 = vadd.f32 %v930_v50, %v380_v47  ;;  %v1616_v50 = vpop.permute.xlu0 %576  ;;  %1012 = vmatprep.mubr.msk.f32.mxu1 %vm1112_vm0, %v1104_v3 }
  0xd2   :  { %v349_v60 = vpop.permute.xlu1 %348  ;;  %546 = vmatprep.mubr.f32.mxu0 %v432_v55 }
  0xd3   :  { %vm357_vm6 = vcmp.eq.s32.totalorder %v1357_v61, %v349_v60  ;;  %vm358_vm7 = vcmp.eq.s32.totalorder %v1362_v63, %v349_v60  ;;  %547 = vmatmul.mubr.f32.gmra.mxu0 %v431_v54 }
  0xd4   :  { %v923_v5 = vsel %vm357_vm6, 1.0, %v1104_v3  ;;  %v924_v18 = vsel %vm358_vm7, 1.0, %v1104_v3  ;;  %v75_v55 = vpop.permute.xlu0 %74 }
  0xd5   :  { %v381_v22 = vadd.f32 %v923_v5, %v329_v9  ;;  %v382_v23 = vadd.f32 %v924_v18, %v330_v15  ;;  %v78_v57 = vmul.f32 %v1382_v7, %v75_v55 }
  0xd7   :  { %v300_v32 = vpop.permute.xlu1 %299  ;;  %v434_v33 = vadd.f32 %v932_v17, %v382_v23  ;;  %v433_v36 = vadd.f32 %v931_v16, %v381_v22 }
  0xd8   :  { %vm307_vm10 = vcmp.eq.s32.totalorder %v1357_v61, %v300_v32  ;;  %vm308_vm11 = vcmp.eq.s32.totalorder %v1362_v63, %v300_v32  ;;  %v231_v16 = vpop.permute.xlu0 %230  ;;  %v602_v32 = vsub.s32 1, %v597_v27 }
  0xd9   :  { %551 = vmatprep.mubr.f32.mxu0 %v434_v33  ;;  %v917_v39 = vsel %vm307_vm10, 1.0, %v1104_v3  ;;  %v918_v40 = vsel %vm308_vm11, 1.0, %v1104_v3  ;;  %v233_v17 = vmul.f32 %v1401_v13, %v231_v16  ;;  %v234_v5 = vmul.f32 %v1404_v14, %v231_v16  ;;  %v646_v16 = vld [vmem:[%s1760_s4 + $0x40] sm:$0xff] }
  0xda   :  { %552 = vmatmul.mubr.f32.gmra.mxu0 %v433_v36  ;;  %v331_v44 = vadd.f32 %v917_v39, %v279_v37  ;;  %v332_v45 = vadd.f32 %v918_v40, %v280_v41  ;;  %v598_v14 = vsub.s32 0, %v597_v27  ;;  %v641_v41 = vld [vmem:[%s1760_s4 + $0x18] sm:$0xff] }
  0xdb   :  { %1005 = vmatpush3.msra.mxu1 %v641_v41 }
  0xdc   :  { %v352_v38 = vpop.permute.xlu1 %351  ;;  %v387_v28 = vpop.permute.xlu0 %386  ;;  %1006 = vmatprep.subr.mxu1 %v1104_v3 }
  0xdd   :  { %vm359_vm12 = vcmp.eq.s32.totalorder %v1357_v61, %v352_v38  ;;  %vm360_vm13 = vcmp.eq.s32.totalorder %v1362_v63, %v352_v38  ;;  %v389_v33 = vmul.f32 %v1437_v29, %v387_v28  ;;  %v390_v36 = vmul.f32 %v1440_v30, %v387_v28  ;;  %v650_v28 = vld [vmem:[%s1758_s3 + $0x3] ss:$0 sm:$0xff] }
  0xde   :  { %v925_v42 = vsel %vm359_vm12, 1.0, %v1104_v3  ;;  %v926_v43 = vsel %vm360_vm13, 1.0, %v1104_v3  ;;  %v603_v38 = vrot.slane %v594_v58, %v602_v32 }
  0xdf   :  { %v383_v47 = vadd.f32 %v925_v42, %v331_v44  ;;  %v384_v48 = vadd.f32 %v926_v43, %v332_v45  ;;  %v638_v42 = vld [vmem:[%s1760_s4] sm:$0xff] }
  0xe1   :  { %v404_v46 = vpop.permute.xlu1 %403 }
  0xe2   :  { %vm411_vm14 = vcmp.eq.s32.totalorder %v1357_v61, %v404_v46  ;;  %vm412_vm15 = vcmp.eq.s32.totalorder %v1362_v63, %v404_v46  ;;  %v77_v63 = vmul.f32 %v1379_v6, %v75_v55 }
  0xe3   :  { %v933_v19 = vsel %vm411_vm14, 1.0, %v1104_v3  ;;  %v934_v49 = vsel %vm412_vm15, 1.0, %v1104_v3 }
  0xe4   :  { %v435_v51 = vadd.f32 %v933_v19, %v383_v47  ;;  %v436_v52 = vadd.f32 %v934_v49, %v384_v48 }
  0xe5   :  { %v1618_v53 = vpop.permute.xlu1 %582 }
  0xe6   :  { %556 = vmatprep.mubr.f32.mxu0 %v436_v52 }
  0xe7   :  { %557 = vmatmul.mubr.f32.gmra.mxu0 %v435_v51  ;;  %v631_v51 = vld [vmem:[%s1758_s3 + $0x4] ss:$0 sm:$0xff] }
  0xe9   :  { %v127_v54 = vpop.permute.xlu1 %126 }
  0xea   :  { %v129_v56 = vmul.f32 %v1371_v1, %v127_v54  ;;  %v130_v61 = vmul.f32 %v1374_v2, %v127_v54 }
  0xec   :  { %v131_v0 = vadd.f32 %v129_v56, %v77_v63  ;;  %v132_v60 = vadd.f32 %v130_v61, %v78_v57 }
  0xee   :  { %v179_v59 = vpop.permute.xlu1 %178 }
  0xef   :  { %v181_v9 = vmul.f32 %v1395_v11, %v179_v59  ;;  %v182_v15 = vmul.f32 %v1398_v12, %v179_v59 }
  0xf1   :  { %v183_v18 = vadd.f32 %v181_v9, %v131_v0  ;;  %v184_v1 = vadd.f32 %v182_v15, %v132_v60  ;;  %v649_v60 = vld [vmem:[%s1760_s4 + $0x58] sm:$0xff]  ;;  %v648_v9 = vld [vmem:[%s1760_s4 + $0x50] sm:$0xff]  ;;  %v647_v15 = vld [vmem:[%s1760_s4 + $0x48] sm:$0xff] }
  0xf3   :  { %v283_v22 = vpop.permute.xlu1 %282  ;;  %v235_v2 = vadd.f32 %v233_v17, %v183_v18  ;;  %v236_v23 = vadd.f32 %v234_v5, %v184_v1  ;;  %v645_v17 = vld [vmem:[%s1760_s4 + $0x38] sm:$0xff]  ;;  %v644_v5 = vld [vmem:[%s1760_s4 + $0x30] sm:$0xff]  ;;  %v643_v18 = vld [vmem:[%s1760_s4 + $0x28] sm:$0xff] }
  0xf4   :  { %v285_v6 = vmul.f32 %v1417_v20, %v283_v22  ;;  %v286_v7 = vmul.f32 %v1420_v21, %v283_v22  ;;  %v642_v1 = vld [vmem:[%s1760_s4 + $0x20] sm:$0xff] }
  0xf6   :  { %v287_v31 = vadd.f32 %v285_v6, %v235_v2  ;;  %v288_v12 = vadd.f32 %v286_v7, %v236_v23 }
  0xf8   :  { %v335_v11 = vpop.permute.xlu1 %334 }
  0xf9   :  { %v337_v26 = vmul.f32 %v1425_v24, %v335_v11  ;;  %v338_v13 = vmul.f32 %v1428_v25, %v335_v11  ;;  %v599_v25 = vrot.slane %v594_v58, %v598_v14 }
  0xfb   :  { %v339_v4 = vadd.f32 %v337_v26, %v287_v31  ;;  %v340_v20 = vadd.f32 %v338_v13, %v288_v12 }
  0xfd   :  { %v439_v21 = vpop.permute.xlu1 %438  ;;  %v391_v8 = vadd.f32 %v389_v33, %v339_v4  ;;  %v392_v62 = vadd.f32 %v390_v36, %v340_v20 }
  0xfe   :  { %v441_v10 = vmul.f32 %v1459_v34, %v439_v21  ;;  %v442_v24 = vmul.f32 %v1462_v35, %v439_v21  ;;  %v640_v34 = vld [vmem:[%s1760_s4 + $0x10] sm:$0xff]  ;;  %v639_v35 = vld [vmem:[%s1760_s4 + $0x8] sm:$0xff] }
  0xff   :  { %1007 = vmatpush3.msra.mxu1 %v640_v34 }
 0x100   :  { %v443_v39 = vadd.f32 %v441_v10, %v391_v8  ;;  %v444_v40 = vadd.f32 %v442_v24, %v392_v62  ;;  %1008 = vmatprep.subr.mxu1 %v1104_v3 }
 0x101   :  { %1009 = vmatpush3.msra.mxu1 %v639_v35 }
 0x102   :  { %v606_v29 = vmul.f32 %v599_v25, %v443_v39  ;;  %v607_v37 = vmul.f32 %v603_v38, %v444_v40  ;;  %1010 = vmatprep.subr.mxu1 %v1104_v3  ;;  %v613_v38 = vld [vmem:[%s1758_s3 + $0x6] ss:$0 sm:$0xff] }
 0x103   :  { %1011 = vmatpush3.msra.mxu1 %v638_v42 }
 0x104   :  { %v608_v30 = vadd.f32 %v607_v37, %v606_v29  ;;  %1021 = vmatprep.subr.mxu1 %v1104_v3  ;;  %v743_v29 = vld [vmem:[%s1758_s3 + $0x5] ss:$0 sm:$0xff] }
 0x17f   :  { %v974_v43 = vpop.f32.mrf.mxu0 }
 0x181   :  { %v975_v44 = vpop.f32.mrf.mxu0 }
 0x182   :  { %v976_v45 = vadd.f32 %v975_v44, %v974_v43 }
 0x184   :  { %v579_v46 = vadd.f32 %v976_v45, %v1616_v50  ;;  %564 = vrot.lane.b32.xlu1 %v976_v45, %s1113_s28  ;;  %v633_v50 = vmul.f32 0.0, %v631_v51  ;;  %v562_v22 = vmul.f32 %v976_v45, %v976_v45 }
 0x186   :  { %v580_v47 = vmax.f32 %v579_v46, 0.0 }
 0x188   :  { %v585_v48 = vmul.f32 %v1618_v53, %v580_v47 }
 0x18a   :  { %587 = vrot.lane.b32.xlu0 %v585_v48, %s1111_s22 }
 0x193   :  { %v977_v19 = vpop.f32.mrf.mxu0 }
 0x195   :  { %v978_v49 = vpop.f32.mrf.mxu0 }
 0x196   :  { %v979_v52 = vadd.f32 %v978_v49, %v977_v19 }
 0x198   :  { %v1664_v54 = vadd.f32 %v979_v52, %v631_v51 }
 0x19a   :  { %v980_v55 = vpop.f32.mrf.mxu0  ;;  %1013 = vmatmul.mubr.msk.f32.vlgmr.msra.gmra.mxu1 %vm568_vm1, %v1664_v54 }
 0x19b   :  { %1015 = vmatprep.mubr.msk.f32.mxu1 %vm1112_vm0, %v1104_v3  ;;  %1022 = vmatpush3.msra.mxu1 %v649_v60 }
 0x19c   :  { %v981_v53 = vpop.f32.mrf.mxu0  ;;  %1023 = vmatprep.subr.mxu1 %v1104_v3 }
 0x19d   :  { %v982_v56 = vadd.f32 %v981_v53, %v980_v55  ;;  %1024 = vmatpush3.msra.mxu1 %v648_v9 }
 0x19e   :  { %1025 = vmatprep.subr.mxu1 %v1104_v3 }
 0x19f   :  { %v1670_v61 = vadd.f32 %v982_v56, %v633_v50  ;;  %1026 = vmatpush3.msra.mxu1 %v647_v15 }
 0x1a0   :  { %1027 = vmatprep.subr.mxu1 %v1104_v3 }
 0x1a1   :  { %1016 = vmatmul.mubr.msk.f32.gmra.mxu1 %vm568_vm1, %v1670_v61 }
 0x1a2   :  { %1018 = vmatprep.mubr.msk.f32.mxu1 %vm1112_vm0, %v1104_v3  ;;  %1028 = vmatpush3.msra.mxu1 %v646_v16 }
 0x1a3   :  { %1029 = vmatprep.subr.mxu1 %v1104_v3 }
 0x1a4   :  { %1030 = vmatpush3.msra.mxu1 %v645_v17 }
 0x1a5   :  { %1031 = vmatprep.subr.mxu1 %v1104_v3 }
 0x1a6   :  { %1032 = vmatpush3.msra.mxu1 %v644_v5 }
 0x1a7   :  { %v983_v63 = vpop.f32.mrf.mxu0  ;;  %1033 = vmatprep.subr.mxu1 %v1104_v3 }
 0x1a8   :  { %1034 = vmatpush3.msra.mxu1 %v643_v18 }
 0x1a9   :  { %v984_v57 = vpop.f32.mrf.mxu0  ;;  %609 = vadd.xlane.f32.xlu0 %v608_v30  ;;  %1035 = vmatprep.subr.mxu1 %v1104_v3 }
 0x1aa   :  { %v985_v59 = vadd.f32 %v984_v57, %v983_v63  ;;  %1036 = vmatpush3.msra.mxu1 %v642_v1 }
 0x1ac   :  { %v1676_v0 = vadd.f32 %v985_v59, %v633_v50 }
 0x1ae   :  { %1019 = vmatmul.mubr.msk.f32.gmra.mxu1 %vm568_vm1, %v1676_v0 }
 0x1af   :  { %1037 = vmatprep.mubr.msk.f32.mxu1 %vm1112_vm0, %v1104_v3 }
 0x1f6   :  { %v565_v2 = vpop.permute.xlu1 %564 }
 0x1f7   :  { %v567_v23 = vsub.f32 %v562_v22, %v565_v2 }
 0x1f9   :  { %v569_v6 = vsel %vm568_vm1, %v567_v23, 0.0 }
 0x1fa   :  { %570 = vadd.xlane.f32.xlu1 %v569_v6 }
 0x1fc   :  { %v588_v7 = vpop.permute.xlu0 %587 }
 0x1fd   :  { %v591_v27 = vsel %vm590_vm2, %v588_v7, 0.0 }
 0x1fe   :  { %592 = vadd.xlane.f32.xlu0 %v591_v27 }
 0x232   :  { %v610_v62 = vpop.xlane.xlu0 %609 }
 0x25a   :  { %v726_v11 = vpop.f32.mrf.mxu1 }
 0x25b   :  { %v727_v31 = vadd.f32 %v726_v11, %v650_v28 }
 0x25c   :  { %v1014_v12 = vpop.f32.mrf.mxu1 }
 0x25d   :  { %v740_v26 = vmax.f32 %v727_v31, 0.0 }
 0x25f   :  { %1038 = vmatmul.mubr.msk.f32.vlgmr.msra.gmra.mxu1 %vm590_vm2, %v740_v26 }
 0x260   :  { %1040 = vmatprep.mubr.msk.f32.mxu1 %vm1112_vm0, %v1104_v3 }
 0x261   :  { %v731_v13 = vpop.f32.mrf.mxu1 }
 0x262   :  { %v732_v14 = vadd.f32 %v731_v13, %v650_v28 }
 0x263   :  { %v1017_v32 = vpop.f32.mrf.mxu1 }
 0x264   :  { %v741_v33 = vmax.f32 %v732_v14, 0.0 }
 0x266   :  { %1041 = vmatmul.mubr.msk.f32.gmra.mxu1 %vm590_vm2, %v741_v33 }
 0x267   :  { %1043 = vmatprep.mubr.msk.f32.mxu1 %vm1112_vm0, %v1104_v3 }
 0x26e   :  { %v736_v36 = vpop.f32.mrf.mxu1 }
 0x26f   :  { %v737_v4 = vadd.f32 %v736_v36, %v650_v28 }
 0x270   :  { %v1020_v20 = vpop.f32.mrf.mxu1 }
 0x271   :  { %v742_v58 = vmax.f32 %v737_v4, 0.0 }
 0x273   :  { %1044 = vmatmul.mubr.msk.f32.gmra.mxu1 %vm590_vm2, %v742_v58 }
 0x283   :  { %v571_v21 = vpop.xlane.xlu1 %570 }
 0x284   :  { %v572_v8 = vmul.f32 0.5, %v571_v21 }
 0x286   :  { %v611_v10 = vadd.f32 %v610_v62, %v572_v8 }
 0x287   :  { %v593_v24 = vpop.xlane.xlu0 %592 }
 0x288   :  { %v612_v25 = vadd.f32 %v611_v10, %v593_v24 }
 0x28a   :  { %v614_v39 = vadd.f32 %v613_v38, %v612_v25 }
 0x28c   :  { %v935_v40 = vmul.f32 -1.442695, %v614_v39 }
 0x28e   :  { %1098 = vpow2.f32 %v935_v40 }
 0x29b   :  { %v1099_v34 = vpop.eup %1098 }
 0x29c   :  { %v618_v43 = vadd.f32 1.0, %v1099_v34 }
 0x29e   :  { %1100 = vrcp.f32 %v618_v43 }
 0x2ab   :  { %v1101_v48 = vpop.eup %1100 }
 0x31f   :  { %v819_v37 = vpop.f32.mrf.mxu1 }
 0x320   :  { %v820_v30 = vadd.f32 %v819_v37, %v743_v29 }
 0x321   :  { %v1039_v41 = vpop.f32.mrf.mxu1 }
 0x322   :  { %836 = vrot.lane.b32.xlu1 %v820_v30, %s1114_s24 }
 0x326   :  { %v824_v35 = vpop.f32.mrf.mxu1 }
 0x327   :  { %v825_v42 = vadd.f32 %v824_v35, %v743_v29 }
 0x328   :  { %v1042_v44 = vpop.f32.mrf.mxu1 }
 0x329   :  { %838 = vrot.lane.b32.xlu0 %v825_v42, %s1114_s24 }
 0x32d   :  { %849 = vrot.lane.b32.xlu0 %v1104_v3, %s1115_s25 }
 0x333   :  { %v829_v45 = vpop.f32.mrf.mxu1 }
 0x334   :  { %v830_v46 = vadd.f32 %v829_v45, %v743_v29 }
 0x335   :  { %v1045_v47 = vpop.f32.mrf.mxu1 }
 0x336   :  { %840 = vrot.lane.b32.xlu1 %v830_v46, %s1114_s24 }
 0x33a   :  { %847 = vrot.lane.b32.xlu1 %v1101_v48, %s1115_s25 }
 0x394   :  { %v837_v3 = vpop.permute.xlu1 %836 }
 0x39b   :  { %v839_v19 = vpop.permute.xlu0 %838 }
 0x39c   :  { %v854_v49 = vsel %vm568_vm1, %v1670_v61, %v839_v19  ;;  %v853_v61 = vsel %vm568_vm1, %v1664_v54, %v837_v3 }
 0x39f   :  { %v850_v51 = vpop.permute.xlu0 %849 }
 0x3a0   :  { %v858_v52 = vsel %vm856_vm3, %v854_v49, %v850_v51 }
 0x3a1   :  { %v862_v55 = vsel %vm860_vm4, %v858_v52, 0.0 }
 0x3a2   :  { %865 = vst.msk [vmem:[%s1761_s5 + $0x8] sm:$0xff] %vm590_vm2, %v862_v55 }
 0x3a8   :  { %v841_v50 = vpop.permute.xlu1 %840 }
 0x3a9   :  { %v855_v53 = vsel %vm568_vm1, %v1676_v0, %v841_v50 }
 0x3aa   :  { %v859_v56 = vsel %vm856_vm3, %v855_v53, %v850_v51 }
 0x3ab   :  { %v863_v63 = vsel %vm860_vm4, %v859_v56, 0.0 }
 0x3ac   :  { %866 = vst.msk [vmem:[%s1761_s5 + $0x10] sm:$0xff] %vm590_vm2, %v863_v63  ;;  %v848_v57 = vpop.permute.xlu1 %847 }
 0x3ad   :  { %v857_v59 = vsel %vm856_vm3, %v853_v61, %v848_v57 }
 0x3ae   :  { %v861_v60 = vsel %vm860_vm4, %v857_v59, 0.0 }
 0x3af   :  { %864 = vst.msk [vmem:[%s1761_s5] sm:$0xff] %vm590_vm2, %v861_v60 }

</bundles_post_ra>
